<compile_context>
chip_gen: v5e
topology: v5e:2x2
jax: 0.10.0
libtpu: 0.0.40
codegen_flags: <defaults>
</compile_context>

<pallas_src>
import functools

import numpy as np

import jax
import jax.numpy as jnp
from jax.experimental import pallas as pl
from jax.experimental.pallas import tpu as pltpu


def _round_up(n, m):
    return ((n + m - 1) // m) * m


def _num_tensorcores_per_chip():
    """Best-effort detection of per-chip TensorCore count (2 on v7x, else 1)."""
    try:
        kind = jax.devices()[0].device_kind.lower()
    except Exception:
        return 1
    return 2 if ("v7" in kind or "7x" in kind) else 1


def _resident_weight_spec(shape):
    """Grid-invariant, single-buffered weight BlockSpec (stays resident in VMEM)."""
    try:
        return pl.BlockSpec(shape, lambda i: (0, 0), pipeline_mode=pl.Buffered(1))
    except TypeError:  # older jax without pipeline_mode kwarg
        return pl.BlockSpec(shape, lambda i: (0, 0))


def prepare_weights(weights, compute_dtype=jnp.bfloat16):
    """One-time weight prep.  Call at init time, NOT per forward call.

    - Pads each weight's output (column/N) dim up to a multiple of 128
      (lane-dense vregs, full MXU N, unmasked stores).
    - Pads each weight's input (row/K) dim to match the previous layer's padded
      output width.  The first layer's rows are left un-padded because x is fed
      to the kernel with its original feature width.
    - Casts to `compute_dtype` (bf16 by default: native MXU rate with f32 acc).

    Zero padding is correct here because Linear(bias=False) + ReLU preserves
    zeros in the padded lanes.
    """
    prepped = []
    prev_out_padded = weights[0].shape[0]          # = x_dim, un-padded K for layer 0
    for w in weights:
        k, n = w.shape
        n_p = _round_up(n, 128)
        w_p = jnp.pad(w, ((0, prev_out_padded - k), (0, n_p - n))).astype(compute_dtype)
        prepped.append(w_p)
        prev_out_padded = n_p
    return tuple(prepped)


def _make_mlp_kernel(num_weights, compute_dtype):
    """Kernel that runs the whole MLP stack on one batch tile."""

    def kernel(*refs):
        x_ref = refs[0]
        w_refs = refs[1:1 + num_weights]
        o_ref = refs[1 + num_weights]

        # f32 -> compute_dtype cast on the VPU (hidden under MXU work).
        h = x_ref[...].astype(compute_dtype)
        for i in range(num_weights):
            # MXU matmul, narrow operands, f32 accumulation.
            acc = jnp.dot(h, w_refs[i][...], preferred_element_type=jnp.float32)
            if i < num_weights - 1:
                # ReLU on VPU, re-narrow for the next MXU pass.
                h = jnp.maximum(acc, 0.0).astype(compute_dtype)
            else:
                h = acc
        o_ref[...] = h.astype(o_ref.dtype)

    return kernel


@functools.partial(jax.jit, static_argnames=("tile_batch", "out_dtype"))
def tab_transform_net(x, w_prepped, *, tile_batch=512, out_dtype=None):
    """Forward pass of TabTransformNet (fused single Pallas kernel).

    Args:
      x: [batch, x_dim] float32 (un-padded; cast to the weights' dtype in-kernel).
      w_prepped: output of prepare_weights() -- padded, compute-dtype weights,
        each [in_dim_padded, out_dim_padded] ([x_dim, .] for the first layer).
      tile_batch: target batch tile size (rounded to a multiple of 16).
      out_dtype: output dtype (None -> x.dtype). bf16 halves output writeback.
    Returns:
      [batch, x_dim] with dtype out_dtype (default x.dtype).
    """
    batch, x_dim = x.shape
    num_w = len(w_prepped)
    assert w_prepped[0].shape[0] == x_dim, "weights must come from prepare_weights()"

    compute_dtype = w_prepped[0].dtype
    out_p_last = w_prepped[-1].shape[1]
    max_out_p = max(w.shape[1] for w in w_prepped)
    out_dtype = x.dtype if out_dtype is None else out_dtype
    out_itemsize = np.dtype(out_dtype).itemsize
    x_itemsize = np.dtype(x.dtype).itemsize

    weight_bytes = sum(w.size * np.dtype(w.dtype).itemsize for w in w_prepped)

    # ---- batch tile selection: multiple of 16 (bf16 sublane packing), and keep
    #      batch-padding waste below tb/4. ----
    tb = min(_round_up(max(int(tile_batch), 16), 16), _round_up(batch, 16))
    while tb > 16 and (_round_up(batch, tb) - batch) * 4 >= tb:
        tb -= 16

    # ---- VMEM budget guard (conservative across v5e/v6e/v7x) ----
    def est_vmem(t):
        return (weight_bytes                          # resident weights, single-buffered
                + 2 * t * x_dim * x_itemsize          # input tile, double-buffered
                + 2 * t * out_p_last * out_itemsize   # output tile, double-buffered
                + 3 * t * max_out_p * 4               # f32 acc + intermediate h temporaries
                + (1 << 20))                          # slack

    VMEM_BUDGET = 24 << 20
    while tb > 16 and est_vmem(tb) > VMEM_BUDGET:
        tb -= 16
    # TODO(synk): if weight_bytes alone exceeds the budget (very wide/deep nets on
    # v7x's 64 MiB VMEM), stream weights per layer with pltpu.emit_pipeline instead
    # of keeping all layers resident.

    batch_p = _round_up(batch, tb)

    # Megacore: only split a 1-step grid on chips with 2 TensorCores (v7x).
    # On single-TC v5e/v6e the split is pure overhead and halves MXU M per step.
    if _num_tensorcores_per_chip() >= 2 and batch_p // tb < 2 and batch_p % 32 == 0:
        tb = batch_p // 2
    grid = (batch_p // tb,)

    x_in = x if batch_p == batch else jnp.pad(x, ((0, batch_p - batch), (0, 0)))

    kernel = _make_mlp_kernel(num_w, compute_dtype)

    # x: last dim equals the full array dim (allowed), rows are a multiple of 16.
    in_specs = [pl.BlockSpec((tb, x_dim), lambda i: (i, 0))]
    for w in w_prepped:
        in_specs.append(_resident_weight_spec(w.shape))

    out_spec = pl.BlockSpec((tb, out_p_last), lambda i: (i, 0))

    vmem_limit = int(max(4 << 20, min(est_vmem(tb), 64 << 20)))

    out_padded = pl.pallas_call(
        kernel,
        out_shape=jax.ShapeDtypeStruct((batch_p, out_p_last), out_dtype),
        grid_spec=pltpu.PrefetchScalarGridSpec(
            num_scalar_prefetch=0,
            grid=grid,
            in_specs=in_specs,
            out_specs=out_spec,
        ),
        compiler_params=pltpu.CompilerParams(
            dimension_semantics=("parallel",),
            vmem_limit_bytes=vmem_limit),
    )(x_in, *w_prepped)

    # Slice away batch padding and the lane padding on the last layer's output.
    return out_padded[:batch, :x_dim]


def init_params(key, x_dim, h_dim, num_layers):
    """Deterministic parameter init matching the module's layer shapes.

    Returns raw f32 weights already transposed to [in_dim, out_dim]
    (i.e. torch Linear.weight.T).
    """
    weights = []
    input_dim = x_dim
    for _ in range(num_layers - 1):
        key, sub = jax.random.split(key)
        bound = 1.0 / jnp.sqrt(input_dim)
        w = jax.random.uniform(sub, (input_dim, h_dim), jnp.float32, -bound, bound)
        weights.append(w)
        input_dim = h_dim
    key, sub = jax.random.split(key)
    bound = 1.0 / jnp.sqrt(input_dim)
    weights.append(jax.random.uniform(sub, (input_dim, x_dim), jnp.float32,
                                      -bound, bound))
    return tuple(weights)


def reference_forward(x, weights):
    """Pure-JAX f32 reference matching the PyTorch module."""
    h = x
    for i, w in enumerate(weights):
        h = h @ w
        if i < len(weights) - 1:
            h = jnp.maximum(h, 0.0)
    return h


if __name__ == "__main__":
    x_dim, h_dim, num_layers = 32, 64, 3
    batch = 64

    key = jax.random.PRNGKey(0)
    key, xk = jax.random.split(key)
    x = jax.random.normal(xk, (batch, x_dim), dtype=jnp.float32)
    weights = init_params(key, x_dim, h_dim, num_layers)

    # One-time weight prep (pad + cast) -- done at init, not per forward call.
    w_prepped = prepare_weights(weights, compute_dtype=jnp.bfloat16)

    out = tab_transform_net(x, w_prepped)
    out = jax.block_until_ready(out)

    ref = reference_forward(x, weights)
    assert out.shape == (batch, x_dim)
    assert out.dtype == x.dtype
    # bf16 MXU operands with f32 accumulation -> widened tolerance vs f32 ref.
    assert jnp.allclose(out, ref, atol=3e-2, rtol=3e-2), (
        float(jnp.max(jnp.abs(out - ref))))

    print("KERNEL_OK")
</pallas_src>

<mosaic_0001>
module attributes {stable_mosaic.version = 11 : i64} {
  func.func @kernel(%arg0: i32, %arg1: memref<64x32xf32, #tpu.memory_space<vmem>>, %arg2: memref<32x128xbf16, #tpu.memory_space<vmem>>, %arg3: memref<128x128xbf16, #tpu.memory_space<vmem>>, %arg4: memref<128x128xbf16, #tpu.memory_space<vmem>>, %arg5: memref<64x128xf32, #tpu.memory_space<vmem>>) attributes {dimension_semantics = [#tpu.dimension_semantics<parallel>], iteration_bounds = array<i64: 1>, scalar_prefetch = 0 : i64, scratch_operands = 0 : i64, tpu.core_type = #tpu.core_type<tc>, window_params = [{transform_indices = @transform_0, window_bounds = array<i64: 64, 32>}, {pipeline_mode = #tpu.pipeline_mode<synchronous>, transform_indices = @transform_1, window_bounds = array<i64: 32, 128>}, {pipeline_mode = #tpu.pipeline_mode<synchronous>, transform_indices = @transform_2, window_bounds = array<i64: 128, 128>}, {pipeline_mode = #tpu.pipeline_mode<synchronous>, transform_indices = @transform_3, window_bounds = array<i64: 128, 128>}, {transform_indices = @transform_4, window_bounds = array<i64: 64, 128>}]} {
    %c0 = arith.constant 0 : index
    %c0_0 = arith.constant 0 : index
    %0 = vector.load %arg1[%c0, %c0_0] : memref<64x32xf32, #tpu.memory_space<vmem>>, vector<64x32xf32>
    %1 = arith.truncf %0 : vector<64x32xf32> to vector<64x32xbf16>
    %c0_1 = arith.constant 0 : index
    %c0_2 = arith.constant 0 : index
    %2 = vector.load %arg2[%c0_1, %c0_2] : memref<32x128xbf16, #tpu.memory_space<vmem>>, vector<32x128xbf16>
    %cst = arith.constant dense<0.000000e+00> : vector<64x128xf32>
    %3 = tpu.matmul %1, %2, %cst {dimension_numbers = #tpu.dot_dimension_numbers<[1], [0], [0], [1], [0, 0, 1, 1], [], []>} : vector<64x32xbf16>, vector<32x128xbf16>, vector<64x128xf32> -> vector<64x128xf32>
    %cst_3 = arith.constant 0.000000e+00 : f32
    %4 = vector.broadcast %cst_3 : f32 to vector<64x128xf32>
    %5 = arith.maximumf %3, %4 : vector<64x128xf32>
    %6 = arith.truncf %5 : vector<64x128xf32> to vector<64x128xbf16>
    %c0_4 = arith.constant 0 : index
    %c0_5 = arith.constant 0 : index
    %7 = vector.load %arg3[%c0_4, %c0_5] : memref<128x128xbf16, #tpu.memory_space<vmem>>, vector<128x128xbf16>
    %cst_6 = arith.constant dense<0.000000e+00> : vector<64x128xf32>
    %8 = tpu.matmul %6, %7, %cst_6 {dimension_numbers = #tpu.dot_dimension_numbers<[1], [0], [0], [1], [0, 0, 1, 1], [], []>} : vector<64x128xbf16>, vector<128x128xbf16>, vector<64x128xf32> -> vector<64x128xf32>
    %cst_7 = arith.constant 0.000000e+00 : f32
    %9 = vector.broadcast %cst_7 : f32 to vector<64x128xf32>
    %10 = arith.maximumf %8, %9 : vector<64x128xf32>
    %11 = arith.truncf %10 : vector<64x128xf32> to vector<64x128xbf16>
    %c0_8 = arith.constant 0 : index
    %c0_9 = arith.constant 0 : index
    %12 = vector.load %arg4[%c0_8, %c0_9] : memref<128x128xbf16, #tpu.memory_space<vmem>>, vector<128x128xbf16>
    %cst_10 = arith.constant dense<0.000000e+00> : vector<64x128xf32>
    %13 = tpu.matmul %11, %12, %cst_10 {dimension_numbers = #tpu.dot_dimension_numbers<[1], [0], [0], [1], [0, 0, 1, 1], [], []>} : vector<64x128xbf16>, vector<128x128xbf16>, vector<64x128xf32> -> vector<64x128xf32>
    %c0_11 = arith.constant 0 : index
    %c0_12 = arith.constant 0 : index
    %14 = vector.load %arg5[%c0_11, %c0_12] : memref<64x128xf32, #tpu.memory_space<vmem>>, vector<64x128xf32>
    tpu.vector_store %arg5[%c0_11, %c0_12], %13 {strides = array<i32>} : memref<64x128xf32, #tpu.memory_space<vmem>>, vector<64x128xf32>,
    return
  }
  func.func @transform_0(%arg0: i32) -> (i32, i32) {
    %c0_i32 = arith.constant 0 : i32
    %c0_i32_0 = arith.constant 0 : i32
    return %arg0, %c0_i32 : i32, i32
  }
  func.func @transform_1(%arg0: i32) -> (i32, i32) {
    %c0_i32 = arith.constant 0 : i32
    %c0_i32_0 = arith.constant 0 : i32
    %c0_i32_1 = arith.constant 0 : i32
    return %c0_i32, %c0_i32_0 : i32, i32
  }
  func.func @transform_2(%arg0: i32) -> (i32, i32) {
    %c0_i32 = arith.constant 0 : i32
    %c0_i32_0 = arith.constant 0 : i32
    %c0_i32_1 = arith.constant 0 : i32
    return %c0_i32, %c0_i32_0 : i32, i32
  }
  func.func @transform_3(%arg0: i32) -> (i32, i32) {
    %c0_i32 = arith.constant 0 : i32
    %c0_i32_0 = arith.constant 0 : i32
    %c0_i32_1 = arith.constant 0 : i32
    return %c0_i32, %c0_i32_0 : i32, i32
  }
  func.func @transform_4(%arg0: i32) -> (i32, i32) {
    %c0_i32 = arith.constant 0 : i32
    %c0_i32_0 = arith.constant 0 : i32
    return %arg0, %c0_i32 : i32, i32
  }
}

</mosaic_0001>

<bundles_post_ra>
// kernel: tab_transform_net.1
= control target key start
LH: loop header
LB: loop body
LE: loop exit
PB: predicated region body
PF: predicated region fallthrough
CT: control target
= control target key end

     0   :  { %9 = vsyncpa [#allocation3], 0  ;;  %s466_s18 = smov [#allocation2]   ;;  %s467_s20 = smov 64   ;;  %s579_s0 = inlined_call_operand.vmem [shape: f32[64,32], index: 0, kind: input, shape index: {}]   ;;  %s580_s1 = inlined_call_operand.vmem [shape: bf16[32,128], index: 1, kind: input, shape index: {}]   ;;  %s581_s2 = inlined_call_operand.vmem [shape: bf16[128,128], index: 2, kind: input, shape index: {}]   ;;  %s582_s3 = inlined_call_operand.hbm [shape: bf16[128,128], index: 3, kind: input, shape index: {}]   ;;  %s583_s4 = inlined_call_operand.vmem [shape: f32[64,128], index: 4, kind: output, shape index: {}]  }
   0x1   :  { %s20_s17 = sshll.u32 %s582_s3, 4  ;;  %s22_s19 = sshll.u32 %s466_s18, 4  ;;  %s21_s17 = int_to_ptr.hbm [resolvable:$true] %s20_s17  ;;  %s23_s19 = int_to_ptr.vmem [resolvable:$true] %s22_s19 }
   0x2   :  { %s468_s21 = smov 4  }
   0x3   :  { %28 = dma.hbm_to_vmem [thread:$0]  %s21_s17, 1024, %s23_s19, [#allocation3], %s467_s20, %s467_s20, %s468_s21  }
   0x4   :  { %464 = dma.done.wait [#allocation3], 1024  }
   0x5   :  { %465 = vsyncadd [#allocation3], 4294966272  ;;  %v404_v0 = vld [vmem:[%s580_s1 + $0x8] sm:$0xff]  ;;  %v403_v1 = vld [vmem:[%s580_s1] sm:$0xff]  ;;  %vm62_vm0 = vcmask 261120  }
   0x6   :  { %81 = vmatpush.bf16.msra.mxu0 %v404_v0  ;;  %v34_v2 = vld [vmem:[%s579_s0] sm:$0xff]  ;;  %v35_v3 = vld [vmem:[%s579_s0 + $0x8] sm:$0xff]  ;;  %v36_v5 = vld [vmem:[%s579_s0 + $0x10] sm:$0xff] }
   0x7   :  { %v42_v4 = vpack.c.bf16 %v35_v3, %v34_v2  ;;  %v37_v6 = vld [vmem:[%s579_s0 + $0x18] sm:$0xff]  ;;  %v411_v9 = vld [vmem:[%s581_s2 + $0x30] sm:$0xff]  ;;  %v410_v10 = vld [vmem:[%s581_s2 + $0x28] sm:$0xff] }
   0x8   :  { %v43_v7 = vpack.c.bf16 %v37_v6, %v36_v5  ;;  %v412_v8 = vld [vmem:[%s581_s2 + $0x38] sm:$0xff]  ;;  %v38_v11 = vld [vmem:[%s579_s0 + $0x20] sm:$0xff]  ;;  %v39_v12 = vld [vmem:[%s579_s0 + $0x28] sm:$0xff] }
   0x9   :  { %180 = vmatpush.bf16.msra.mxu1 %v412_v8  ;;  %421 = vmatpush.bf16.msra.mxu3 %v412_v8  ;;  %v409_v13 = vld [vmem:[%s581_s2 + $0x20] sm:$0xff]  ;;  %v44_v14 = vpack.c.bf16 %v39_v12, %v38_v11  ;;  %v408_v15 = vld [vmem:[%s581_s2 + $0x18] sm:$0xff]  ;;  %v40_v16 = vld [vmem:[%s579_s0 + $0x30] sm:$0xff] }
   0xa   :  { %82 = vmatpush.bf16.msra.mxu0 %v403_v1  ;;  %v41_v17 = vld [vmem:[%s579_s0 + $0x38] sm:$0xff]  ;;  %v407_v19 = vld [vmem:[%s581_s2 + $0x10] sm:$0xff]  ;;  %v406_v20 = vld [vmem:[%s581_s2 + $0x8] sm:$0xff] }
   0xb   :  { %v45_v18 = vpack.c.bf16 %v41_v17, %v40_v16  ;;  %v405_v21 = vld [vmem:[%s581_s2] sm:$0xff]  ;;  %v420_v32 = vld [vmem:[#allocation2 + $0x38] sm:$0xff]  ;;  %v419_v33 = vld [vmem:[#allocation2 + $0x30] sm:$0xff] }
   0xc   :  { %429 = vmatpush.bf16.msra.mxu2 %v420_v32  ;;  %v418_v35 = vld [vmem:[#allocation2 + $0x28] sm:$0xff]  ;;  %v417_v36 = vld [vmem:[#allocation2 + $0x20] sm:$0xff]  ;;  %v416_v41 = vld [vmem:[#allocation2 + $0x18] sm:$0xff] }
   0xd   :  { %335 = vmatmul.msk.bf16.vlgmr.msra.gmra.mxu0 %vm62_vm0, %v42_v4  ;;  %181 = vmatpush.bf16.msra.mxu1 %v411_v9  ;;  %v415_v47 = vld [vmem:[#allocation2 + $0x10] sm:$0xff]  ;;  %v414_v48 = vld [vmem:[#allocation2 + $0x8] sm:$0xff]  ;;  %v413_v49 = vld [vmem:[#allocation2] sm:$0xff] }
   0xe   :  { %422 = vmatpush.bf16.msra.mxu3 %v411_v9 }
  0x10   :  { %430 = vmatpush.bf16.msra.mxu2 %v419_v33 }
  0x11   :  { %182 = vmatpush.bf16.msra.mxu1 %v410_v10 }
  0x12   :  { %423 = vmatpush.bf16.msra.mxu3 %v410_v10 }
  0x14   :  { %431 = vmatpush.bf16.msra.mxu2 %v418_v35 }
  0x15   :  { %183 = vmatpush.bf16.msra.mxu1 %v409_v13 }
  0x16   :  { %424 = vmatpush.bf16.msra.mxu3 %v409_v13 }
  0x18   :  { %432 = vmatpush.bf16.msra.mxu2 %v417_v36 }
  0x19   :  { %184 = vmatpush.bf16.msra.mxu1 %v408_v15 }
  0x1a   :  { %425 = vmatpush.bf16.msra.mxu3 %v408_v15 }
  0x1c   :  { %433 = vmatpush.bf16.msra.mxu2 %v416_v41 }
  0x1d   :  { %336 = vmatmul.msk.bf16.gmra.mxu0 %vm62_vm0, %v43_v7  ;;  %185 = vmatpush.bf16.msra.mxu1 %v407_v19 }
  0x1e   :  { %426 = vmatpush.bf16.msra.mxu3 %v407_v19 }
  0x20   :  { %434 = vmatpush.bf16.msra.mxu2 %v415_v47 }
  0x21   :  { %186 = vmatpush.bf16.msra.mxu1 %v406_v20 }
  0x22   :  { %427 = vmatpush.bf16.msra.mxu3 %v406_v20 }
  0x24   :  { %435 = vmatpush.bf16.msra.mxu2 %v414_v48 }
  0x25   :  { %187 = vmatpush.bf16.msra.mxu1 %v405_v21 }
  0x26   :  { %428 = vmatpush.bf16.msra.mxu3 %v405_v21 }
  0x28   :  { %436 = vmatpush.bf16.msra.mxu2 %v413_v49 }
  0x29   :  { %285 = vmatpush.bf16.msrb.mxu1 %v420_v32 }
  0x2d   :  { %337 = vmatmul.msk.bf16.gmra.mxu0 %vm62_vm0, %v44_v14  ;;  %286 = vmatpush.bf16.msrb.mxu1 %v419_v33 }
  0x31   :  { %287 = vmatpush.bf16.msrb.mxu1 %v418_v35 }
  0x35   :  { %288 = vmatpush.bf16.msrb.mxu1 %v417_v36 }
  0x39   :  { %289 = vmatpush.bf16.msrb.mxu1 %v416_v41 }
  0x3d   :  { %338 = vmatmul.msk.bf16.gmra.mxu0 %vm62_vm0, %v45_v18  ;;  %290 = vmatpush.bf16.msrb.mxu1 %v415_v47 }
  0x41   :  { %291 = vmatpush.bf16.msrb.mxu1 %v414_v48 }
  0x45   :  { %292 = vmatpush.bf16.msrb.mxu1 %v413_v49 }
  0x8a   :  { %v84_v22 = vpop.f32.mrf.mxu0 }
  0x8b   :  { %v104_v24 = vmax.f32 %v84_v22, 0.0 }
  0x92   :  { %v86_v23 = vpop.f32.mrf.mxu0 }
  0x93   :  { %v105_v25 = vmax.f32 %v86_v23, 0.0 }
  0x95   :  { %v112_v26 = vpack.c.bf16 %v105_v25, %v104_v24 }
  0x97   :  { %188 = vmatmul.bf16.vlgmr.msra.gmra.mxu1 %v112_v26 }
  0x9a   :  { %v89_v27 = vpop.f32.mrf.mxu0 }
  0x9b   :  { %v106_v29 = vmax.f32 %v89_v27, 0.0 }
  0xa2   :  { %v91_v28 = vpop.f32.mrf.mxu0 }
  0xa3   :  { %v107_v30 = vmax.f32 %v91_v28, 0.0 }
  0xa5   :  { %v113_v31 = vpack.c.bf16 %v107_v30, %v106_v29 }
  0xa7   :  { %193 = vmatmul.bf16.vlgmr.msra.gmra.mxu3 %v113_v31 }
  0xaa   :  { %v94_v34 = vpop.f32.mrf.mxu0 }
  0xab   :  { %v108_v38 = vmax.f32 %v94_v34, 0.0 }
  0xb2   :  { %v96_v37 = vpop.f32.mrf.mxu0 }
  0xb3   :  { %v109_v39 = vmax.f32 %v96_v37, 0.0 }
  0xb5   :  { %v114_v40 = vpack.c.bf16 %v109_v39, %v108_v38 }
  0xb7   :  { %198 = vmatmul.bf16.gmra.mxu3 %v114_v40 }
  0xba   :  { %v99_v42 = vpop.f32.mrf.mxu0 }
  0xbb   :  { %v110_v44 = vmax.f32 %v99_v42, 0.0 }
  0xc2   :  { %v101_v43 = vpop.f32.mrf.mxu0 }
  0xc3   :  { %v111_v45 = vmax.f32 %v101_v43, 0.0 }
  0xc5   :  { %v115_v46 = vpack.c.bf16 %v111_v45, %v110_v44 }
  0xc7   :  { %203 = vmatmul.bf16.gmra.mxu3 %v115_v46 }
 0x114   :  { %v189_v50 = vpop.f32.mrf.mxu1 }
 0x115   :  { %v209_v52 = vmax.f32 %v189_v50, 0.0 }
 0x11c   :  { %v191_v51 = vpop.f32.mrf.mxu1 }
 0x11d   :  { %v210_v53 = vmax.f32 %v191_v51, 0.0 }
 0x11f   :  { %v217_v54 = vpack.c.bf16 %v210_v53, %v209_v52 }
 0x121   :  { %293 = vmatmul.bf16.vlgmr.msrb.gmra.mxu1 %v217_v54 }
 0x12a   :  { %v194_v55 = vpop.f32.mrf.mxu3 }
 0x12b   :  { %v211_v57 = vmax.f32 %v194_v55, 0.0 }
 0x132   :  { %v196_v56 = vpop.f32.mrf.mxu3 }
 0x133   :  { %v212_v58 = vmax.f32 %v196_v56, 0.0 }
 0x135   :  { %v218_v59 = vpack.c.bf16 %v212_v58, %v211_v57 }
 0x137   :  { %298 = vmatmul.bf16.vlgmr.msra.gmra.mxu2 %v218_v59 }
 0x13a   :  { %v199_v60 = vpop.f32.mrf.mxu3 }
 0x13b   :  { %v213_v62 = vmax.f32 %v199_v60, 0.0 }
 0x142   :  { %v201_v61 = vpop.f32.mrf.mxu3 }
 0x143   :  { %v214_v63 = vmax.f32 %v201_v61, 0.0 }
 0x145   :  { %v219_v0 = vpack.c.bf16 %v214_v63, %v213_v62 }
 0x147   :  { %303 = vmatmul.bf16.gmra.mxu2 %v219_v0 }
 0x14a   :  { %v204_v1 = vpop.f32.mrf.mxu3 }
 0x14b   :  { %v215_v3 = vmax.f32 %v204_v1, 0.0 }
 0x152   :  { %v206_v2 = vpop.f32.mrf.mxu3 }
 0x153   :  { %v216_v4 = vmax.f32 %v206_v2, 0.0 }
 0x155   :  { %v220_v5 = vpack.c.bf16 %v216_v4, %v215_v3 }
 0x157   :  { %308 = vmatmul.bf16.gmra.mxu2 %v220_v5 }
 0x19e   :  { %v294_v6 = vpop.f32.mrf.mxu1 }
 0x19f   :  { %314 = vst [vmem:[%s583_s4] sm:$0xff] %v294_v6 }
 0x1a6   :  { %v296_v7 = vpop.f32.mrf.mxu1 }
 0x1a7   :  { %315 = vst [vmem:[%s583_s4 + $0x8] sm:$0xff] %v296_v7 }
 0x1ba   :  { %v299_v8 = vpop.f32.mrf.mxu2 }
 0x1bb   :  { %316 = vst [vmem:[%s583_s4 + $0x10] sm:$0xff] %v299_v8 }
 0x1c2   :  { %v301_v9 = vpop.f32.mrf.mxu2 }
 0x1c3   :  { %317 = vst [vmem:[%s583_s4 + $0x18] sm:$0xff] %v301_v9 }
 0x1ca   :  { %v304_v10 = vpop.f32.mrf.mxu2 }
 0x1cb   :  { %318 = vst [vmem:[%s583_s4 + $0x20] sm:$0xff] %v304_v10 }
 0x1d2   :  { %v306_v11 = vpop.f32.mrf.mxu2 }
 0x1d3   :  { %319 = vst [vmem:[%s583_s4 + $0x28] sm:$0xff] %v306_v11 }
 0x1da   :  { %v309_v12 = vpop.f32.mrf.mxu2 }
 0x1db   :  { %320 = vst [vmem:[%s583_s4 + $0x30] sm:$0xff] %v309_v12 }
 0x1e2   :  { %v311_v13 = vpop.f32.mrf.mxu2 }
 0x1e3   :  { %321 = vst [vmem:[%s583_s4 + $0x38] sm:$0xff] %v311_v13 }
 0x1e4   :  { %326 = vsyncpa [#allocation3], 1 }

</bundles_post_ra>
